<compile_context>
chip_gen: v5e
topology: v5e:2x2
jax: 0.10.0
libtpu: 0.0.40
codegen_flags: <defaults>
</compile_context>

<pallas_src>
import functools

import jax
import jax.numpy as jnp
from jax.experimental import pallas as pl
from jax.experimental.pallas import tpu as pltpu

PAD = 128  # lane-dense feature slab width (one full 128-lane vreg row)


def _full_spec(shape):
    """Single block covering the whole array (legal w.r.t. (8,128) tiling)."""
    zeros = (0,) * len(shape)
    return pl.BlockSpec(shape, lambda: zeros)


# ----------------------------- fused Pallas kernel -----------------------------


def _fused_forward_kernel(edge_ref, x_ref, w_ref, b_ref, o_ref, *, layer_kinds, acts):
    """Whole GraphCustom forward (adjacency build included) on VMEM data.

    edge_ref : (2, E_PAD) int32, padded with -1 (never matches a node id)
    x_ref    : (N, PAD)   fp32, feature-padded with zeros
    w_ref    : (L, PAD, PAD) bf16, each layer zero-padded to the 128x128 slab
    b_ref    : (L, 1, PAD)   fp32, zero-padded
    o_ref    : (N, PAD)   fp32

    Padded feature columns stay inert: padded weight rows/cols and biases are
    zero, so even sigmoid(0)=0.5 in padded lanes of the first layer's output is
    annihilated by the zero rows of the next layer's weight.
    """
    n = x_ref.shape[0]
    e_pad = edge_ref.shape[1]

    # ---- normalized adjacency, built in-kernel (no HBM round trip) ----------
    ei = edge_ref[...]                                   # (2, E_PAD) int32
    src = ei[0:1, :]                                     # (1, E_PAD)
    dst = ei[1:2, :]                                     # (1, E_PAD)
    node_iota = jax.lax.broadcasted_iota(jnp.int32, (n, e_pad), 0)
    src_oh = (node_iota == src).astype(jnp.float32)      # (N, E_PAD)
    dst_oh = (node_iota == dst).astype(jnp.float32)      # (N, E_PAD)
    # adj[t, s] = #edges s->t (duplicate edges summed, matching PyG scatter-add).
    adj = jnp.dot(dst_oh, src_oh.T, preferred_element_type=jnp.float32)  # (N, N)

    row = jax.lax.broadcasted_iota(jnp.int32, (n, n), 0)
    col = jax.lax.broadcasted_iota(jnp.int32, (n, n), 1)
    eye = (row == col).astype(jnp.float32)
    # add_remaining_self_loops: only add a self loop where none exists yet.
    diag = jnp.sum(adj * eye, axis=1, keepdims=True)                     # (N, 1)
    adj = adj + eye * jnp.where(diag > 0.0, 0.0, 1.0)
    deg = jnp.sum(adj, axis=1, keepdims=True)                            # (N, 1)
    d_inv_sqrt = jnp.where(deg > 0.0, jax.lax.rsqrt(deg), 0.0)           # (N, 1)
    d_mat = eye * d_inv_sqrt                                             # diag(D^-1/2)
    # D^-1/2 A D^-1/2 via two tiny MXU matmuls (avoids a vector transpose).
    adj_hat = jnp.dot(
        d_mat,
        jnp.dot(adj, d_mat, preferred_element_type=jnp.float32),
        preferred_element_type=jnp.float32)                              # (N, N) fp32

    # ---- layer chain ---------------------------------------------------------
    h = x_ref[...]                                                       # (N, PAD) fp32
    for layer, (kind, act) in enumerate(zip(layer_kinds, acts)):
        w = w_ref[layer]                                                 # (PAD, PAD) bf16
        b = b_ref[layer]                                                 # (1, PAD)  fp32
        # bf16 inputs, fp32 accumulation on the MXU.
        z = jnp.dot(h.astype(jnp.bfloat16), w, preferred_element_type=jnp.float32)
        if kind == "gcn":
            # GCNConv: transform first, aggregate with A_hat, bias after aggregation.
            z = jnp.dot(adj_hat, z, preferred_element_type=jnp.float32)
        z = z + b
        if act == "sigmoid":
            h = jax.nn.sigmoid(z)
        elif act == "relu":
            h = jnp.maximum(z, 0.0)
        else:
            h = z
    o_ref[...] = h.astype(o_ref.dtype)


def fused_forward(edge_pad, x_pad, w_slab, b_slab, layer_kinds, acts):
    n = x_pad.shape[0]
    e_pad = edge_pad.shape[1]
    num_layers = w_slab.shape[0]
    n_gcn = sum(1 for k in layer_kinds if k == "gcn")

    flops = (2 * n * n * e_pad                 # one-hot adjacency matmul
             + 2 * 2 * n * n * n               # D @ (A @ D) normalization
             + num_layers * 2 * n * PAD * PAD  # feature transforms
             + n_gcn * 2 * n * n * PAD)        # GCN aggregations
    transcendentals = n * PAD + n              # sigmoid lanes + rsqrt
    bytes_accessed = (edge_pad.size * 4 + x_pad.size * 4 + w_slab.size * 2
                      + b_slab.size * 4 + n * PAD * 4)

    kernel = functools.partial(
        _fused_forward_kernel, layer_kinds=tuple(layer_kinds), acts=tuple(acts))

    return pl.pallas_call(
        kernel,
        out_shape=jax.ShapeDtypeStruct((n, PAD), jnp.float32),
        in_specs=[_full_spec(edge_pad.shape), _full_spec(x_pad.shape),
                  _full_spec(w_slab.shape), _full_spec(b_slab.shape)],
        out_specs=_full_spec((n, PAD)),
        compiler_params=pltpu.CompilerParams(vmem_limit_bytes=16 * 1024 * 1024),
        cost_estimate=pl.CostEstimate(
            flops=int(flops),
            transcendentals=int(transcendentals),
            bytes_accessed=int(bytes_accessed)),
    )(edge_pad, x_pad, w_slab, b_slab)


# ------------------------------ module wrapper ----------------------------------


class GraphCustomPallas:
    """Mirror of GraphCustom (custom_wide_connections=False, dropout=0 / eval)."""

    def __init__(self, key, dim_in, dim_h, dim_out, num_layers,
                 custom_input_layer, custom_input_hidden,
                 custom_output_layer, custom_output_hidden):
        self.dim_out = dim_out

        sizes, kinds, acts = [], [], []
        # input linear layers: sigmoid on the first, relu on the rest
        for i in range(custom_input_layer):
            in_size = dim_in if i == 0 else custom_input_hidden
            out_size = dim_in if i == custom_input_layer - 1 else custom_input_hidden
            sizes.append((in_size, out_size))
            kinds.append("lin")
            acts.append("sigmoid" if i == 0 else "relu")
        # graph layers: GCNConv + relu
        for i in range(num_layers):
            in_size = dim_in if i == 0 else dim_h
            out_size = dim_out if i == num_layers - 1 else dim_h
            sizes.append((in_size, out_size))
            kinds.append("gcn")
            acts.append("relu")
        # output linear layers: relu on all (matches the reference forward,
        # which relu()s the final layer too — intentional, do not "fix").
        for i in range(custom_output_layer):
            in_size = dim_out if i == 0 else custom_output_hidden
            out_size = dim_out if i == custom_output_layer - 1 else custom_output_hidden
            sizes.append((in_size, out_size))
            kinds.append("lin")
            acts.append("relu")

        ws, bs = [], []
        for (fin, fout) in sizes:
            key, kw, kb = jax.random.split(key, 3)
            w = jax.random.normal(kw, (fin, fout), jnp.float32) * 0.1
            b = jax.random.normal(kb, (fout,), jnp.float32) * 0.01
            # Pad ONCE into the lane-dense 128-wide slab; weights in bf16
            # (MXU-native), biases stay fp32.
            ws.append(jnp.pad(w, ((0, PAD - fin), (0, PAD - fout))).astype(jnp.bfloat16))
            bs.append(jnp.pad(b, (0, PAD - fout)).reshape(1, PAD))

        # Single packed slabs -> 2 DMA descriptors instead of 12.
        self._w_slab = jnp.stack(ws)          # (L, PAD, PAD) bf16
        self._b_slab = jnp.stack(bs)          # (L, 1, PAD)   fp32
        self._kinds = tuple(kinds)
        self._acts = tuple(acts)

        w_slab, b_slab = self._w_slab, self._b_slab
        kinds_t, acts_t = self._kinds, self._acts
        dim_out_ = dim_out

        def forward(x, edge_index):
            n, fin0 = x.shape
            e = edge_index.shape[1]
            e_pad = max(PAD, -(-e // PAD) * PAD)
            edge_pad = jnp.pad(edge_index.astype(jnp.int32),
                               ((0, 0), (0, e_pad - e)), constant_values=-1)
            x_pad = jnp.pad(x.astype(jnp.float32), ((0, 0), (0, PAD - fin0)))
            out_pad = fused_forward(edge_pad, x_pad, w_slab, b_slab, kinds_t, acts_t)
            return out_pad[:, :dim_out_]

        # One jit for the whole forward: pad + fused kernel + slice.
        self._forward = jax.jit(forward)

    def __call__(self, x, edge_index):
        return self._forward(x, edge_index)


# ----------------------------------- main ---------------------------------------

if __name__ == "__main__":
    key = jax.random.PRNGKey(0)
    k_x, k_e, k_p = jax.random.split(key, 3)

    N, E = 8, 12
    dim_in, dim_h, dim_out = 4, 32, 6

    x = jax.random.normal(k_x, (N, dim_in), jnp.float32)
    edge_index = jax.random.randint(k_e, (2, E), 0, N, jnp.int32)

    model = GraphCustomPallas(
        k_p, dim_in=dim_in, dim_h=dim_h, dim_out=dim_out, num_layers=2,
        custom_input_layer=2, custom_input_hidden=8,
        custom_output_layer=2, custom_output_hidden=8)

    out = model(x, edge_index)
    out = jax.block_until_ready(out)
    assert out.shape == (N, dim_out)
    assert bool(jnp.all(jnp.isfinite(out)))
    print("KERNEL_OK")
</pallas_src>

<mosaic_0001>
module attributes {stable_mosaic.version = 11 : i64} {
  func.func @_fused_forward_kernel(%arg0: memref<2x128xi32, #tpu.memory_space<vmem>>, %arg1: memref<8x128xf32, #tpu.memory_space<vmem>>, %arg2: memref<6x128x128xbf16, #tpu.memory_space<vmem>>, %arg3: memref<6x1x128xf32, #tpu.memory_space<vmem>>, %arg4: memref<8x128xf32, #tpu.memory_space<vmem>>) attributes {dimension_semantics = [], scalar_prefetch = 0 : i64, scratch_operands = 0 : i64, tpu.core_type = #tpu.core_type<tc>} {
    %c0 = arith.constant 0 : index
    %c0_0 = arith.constant 0 : index
    %0 = vector.load %arg0[%c0, %c0_0] : memref<2x128xi32, #tpu.memory_space<vmem>>, vector<2x128xi32>
    %1 = vector.extract_strided_slice %0 {offsets = [0, 0], sizes = [1, 128], strides = [1, 1]} : vector<2x128xi32> to vector<1x128xi32>
    %2 = vector.extract_strided_slice %0 {offsets = [1, 0], sizes = [1, 128], strides = [1, 1]} : vector<2x128xi32> to vector<1x128xi32>
    %3 = tpu.iota {dimensions = array<i32: 0>} : vector<8x128xi32>
    %4 = vector.broadcast %1 : vector<1x128xi32> to vector<8x128xi32>
    %5 = arith.cmpi eq, %3, %4 : vector<8x128xi32>
    %6 = arith.extui %5 : vector<8x128xi1> to vector<8x128xi32>
    %7 = arith.sitofp %6 : vector<8x128xi32> to vector<8x128xf32>
    %8 = vector.broadcast %2 : vector<1x128xi32> to vector<8x128xi32>
    %9 = arith.cmpi eq, %3, %8 : vector<8x128xi32>
    %10 = arith.extui %9 : vector<8x128xi1> to vector<8x128xi32>
    %11 = arith.sitofp %10 : vector<8x128xi32> to vector<8x128xf32>
    %12 = tpu.transpose %7, [1, 0] : vector<8x128xf32> -> vector<128x8xf32>
    %cst = arith.constant dense<0.000000e+00> : vector<8x8xf32>
    %13 = tpu.matmul %11, %12, %cst {dimension_numbers = #tpu.dot_dimension_numbers<[1], [0], [0], [1], [0, 0, 1, 1], [], []>} : vector<8x128xf32>, vector<128x8xf32>, vector<8x8xf32> -> vector<8x8xf32>
    %14 = tpu.iota {dimensions = array<i32: 0>} : vector<8x8xi32>
    %15 = tpu.iota {dimensions = array<i32: 1>} : vector<8x8xi32>
    %16 = arith.cmpi eq, %14, %15 : vector<8x8xi32>
    %17 = arith.extui %16 : vector<8x8xi1> to vector<8x8xi32>
    %18 = arith.sitofp %17 : vector<8x8xi32> to vector<8x8xf32>
    %19 = arith.mulf %13, %18 : vector<8x8xf32>
    %cst_1 = arith.constant dense<0.000000e+00> : vector<8xf32>
    %20 = vector.multi_reduction <add>, %19, %cst_1 [1] : vector<8x8xf32> to vector<8xf32>
    %21 = vector.shape_cast %20 : vector<8xf32> to vector<8x1xf32>
    %cst_2 = arith.constant 0.000000e+00 : f32
    %22 = vector.broadcast %cst_2 : f32 to vector<8x1xf32>
    %23 = arith.cmpf ogt, %21, %22 : vector<8x1xf32>
    %cst_3 = arith.constant 0.000000e+00 : f32
    %cst_4 = arith.constant 1.000000e+00 : f32
    %24 = vector.broadcast %cst_3 : f32 to vector<8x1xf32>
    %25 = vector.broadcast %cst_4 : f32 to vector<8x1xf32>
    %26 = arith.select %23, %24, %25 : vector<8x1xi1>, vector<8x1xf32>
    %27 = vector.broadcast %26 : vector<8x1xf32> to vector<8x8xf32>
    %28 = arith.mulf %18, %27 : vector<8x8xf32>
    %29 = arith.addf %13, %28 : vector<8x8xf32>
    %cst_5 = arith.constant dense<0.000000e+00> : vector<8xf32>
    %30 = vector.multi_reduction <add>, %29, %cst_5 [1] : vector<8x8xf32> to vector<8xf32>
    %31 = vector.shape_cast %30 : vector<8xf32> to vector<8x1xf32>
    %cst_6 = arith.constant 0.000000e+00 : f32
    %32 = vector.broadcast %cst_6 : f32 to vector<8x1xf32>
    %33 = arith.cmpf ogt, %31, %32 : vector<8x1xf32>
    %34 = math.rsqrt %31 : vector<8x1xf32>
    %cst_7 = arith.constant 0.000000e+00 : f32
    %35 = vector.broadcast %cst_7 : f32 to vector<8x1xf32>
    %36 = arith.select %33, %34, %35 : vector<8x1xi1>, vector<8x1xf32>
    %37 = vector.broadcast %36 : vector<8x1xf32> to vector<8x8xf32>
    %38 = arith.mulf %18, %37 : vector<8x8xf32>
    %cst_8 = arith.constant dense<0.000000e+00> : vector<8x8xf32>
    %39 = tpu.matmul %29, %38, %cst_8 {dimension_numbers = #tpu.dot_dimension_numbers<[1], [0], [0], [1], [0, 0, 1, 1], [], []>} : vector<8x8xf32>, vector<8x8xf32>, vector<8x8xf32> -> vector<8x8xf32>
    %cst_9 = arith.constant dense<0.000000e+00> : vector<8x8xf32>
    %40 = tpu.matmul %38, %39, %cst_9 {dimension_numbers = #tpu.dot_dimension_numbers<[1], [0], [0], [1], [0, 0, 1, 1], [], []>} : vector<8x8xf32>, vector<8x8xf32>, vector<8x8xf32> -> vector<8x8xf32>
    %c0_10 = arith.constant 0 : index
    %c0_11 = arith.constant 0 : index
    %41 = vector.load %arg1[%c0_10, %c0_11] : memref<8x128xf32, #tpu.memory_space<vmem>>, vector<8x128xf32>
    %c0_12 = arith.constant 0 : index
    %c0_13 = arith.constant 0 : index
    %c0_14 = arith.constant 0 : index
    %42 = vector.load %arg2[%c0_12, %c0_13, %c0_14] : memref<6x128x128xbf16, #tpu.memory_space<vmem>>, vector<1x128x128xbf16>
    %43 = vector.shape_cast %42 : vector<1x128x128xbf16> to vector<128x128xbf16>
    %c0_15 = arith.constant 0 : index
    %c0_16 = arith.constant 0 : index
    %c0_17 = arith.constant 0 : index
    %44 = vector.load %arg3[%c0_15, %c0_16, %c0_17] : memref<6x1x128xf32, #tpu.memory_space<vmem>>, vector<1x1x128xf32>
    %45 = vector.shape_cast %44 : vector<1x1x128xf32> to vector<1x128xf32>
    %46 = arith.truncf %41 : vector<8x128xf32> to vector<8x128xbf16>
    %cst_18 = arith.constant dense<0.000000e+00> : vector<8x128xf32>
    %47 = tpu.matmul %46, %43, %cst_18 {dimension_numbers = #tpu.dot_dimension_numbers<[1], [0], [0], [1], [0, 0, 1, 1], [], []>} : vector<8x128xbf16>, vector<128x128xbf16>, vector<8x128xf32> -> vector<8x128xf32>
    %48 = vector.broadcast %45 : vector<1x128xf32> to vector<8x128xf32>
    %49 = arith.addf %47, %48 : vector<8x128xf32>
    %50 = arith.negf %49 : vector<8x128xf32>
    %51 = math.exp %50 : vector<8x128xf32>
    %cst_19 = arith.constant 1.000000e+00 : f32
    %52 = vector.broadcast %cst_19 : f32 to vector<8x128xf32>
    %53 = arith.addf %52, %51 : vector<8x128xf32>
    %54 = arith.divf %52, %53 : vector<8x128xf32>
    %c1 = arith.constant 1 : index
    %c0_20 = arith.constant 0 : index
    %c0_21 = arith.constant 0 : index
    %55 = vector.load %arg2[%c1, %c0_20, %c0_21] : memref<6x128x128xbf16, #tpu.memory_space<vmem>>, vector<1x128x128xbf16>
    %56 = vector.shape_cast %55 : vector<1x128x128xbf16> to vector<128x128xbf16>
    %c1_22 = arith.constant 1 : index
    %c0_23 = arith.constant 0 : index
    %c0_24 = arith.constant 0 : index
    %57 = vector.load %arg3[%c1_22, %c0_23, %c0_24] : memref<6x1x128xf32, #tpu.memory_space<vmem>>, vector<1x1x128xf32>
    %58 = vector.shape_cast %57 : vector<1x1x128xf32> to vector<1x128xf32>
    %59 = arith.truncf %54 : vector<8x128xf32> to vector<8x128xbf16>
    %cst_25 = arith.constant dense<0.000000e+00> : vector<8x128xf32>
    %60 = tpu.matmul %59, %56, %cst_25 {dimension_numbers = #tpu.dot_dimension_numbers<[1], [0], [0], [1], [0, 0, 1, 1], [], []>} : vector<8x128xbf16>, vector<128x128xbf16>, vector<8x128xf32> -> vector<8x128xf32>
    %61 = vector.broadcast %58 : vector<1x128xf32> to vector<8x128xf32>
    %62 = arith.addf %60, %61 : vector<8x128xf32>
    %cst_26 = arith.constant 0.000000e+00 : f32
    %63 = vector.broadcast %cst_26 : f32 to vector<8x128xf32>
    %64 = arith.maximumf %62, %63 : vector<8x128xf32>
    %c2 = arith.constant 2 : index
    %c0_27 = arith.constant 0 : index
    %c0_28 = arith.constant 0 : index
    %65 = vector.load %arg2[%c2, %c0_27, %c0_28] : memref<6x128x128xbf16, #tpu.memory_space<vmem>>, vector<1x128x128xbf16>
    %66 = vector.shape_cast %65 : vector<1x128x128xbf16> to vector<128x128xbf16>
    %c2_29 = arith.constant 2 : index
    %c0_30 = arith.constant 0 : index
    %c0_31 = arith.constant 0 : index
    %67 = vector.load %arg3[%c2_29, %c0_30, %c0_31] : memref<6x1x128xf32, #tpu.memory_space<vmem>>, vector<1x1x128xf32>
    %68 = vector.shape_cast %67 : vector<1x1x128xf32> to vector<1x128xf32>
    %69 = arith.truncf %64 : vector<8x128xf32> to vector<8x128xbf16>
    %cst_32 = arith.constant dense<0.000000e+00> : vector<8x128xf32>
    %70 = tpu.matmul %69, %66, %cst_32 {dimension_numbers = #tpu.dot_dimension_numbers<[1], [0], [0], [1], [0, 0, 1, 1], [], []>} : vector<8x128xbf16>, vector<128x128xbf16>, vector<8x128xf32> -> vector<8x128xf32>
    %cst_33 = arith.constant dense<0.000000e+00> : vector<8x128xf32>
    %71 = tpu.matmul %40, %70, %cst_33 {dimension_numbers = #tpu.dot_dimension_numbers<[1], [0], [0], [1], [0, 0, 1, 1], [], []>} : vector<8x8xf32>, vector<8x128xf32>, vector<8x128xf32> -> vector<8x128xf32>
    %72 = vector.broadcast %68 : vector<1x128xf32> to vector<8x128xf32>
    %73 = arith.addf %71, %72 : vector<8x128xf32>
    %cst_34 = arith.constant 0.000000e+00 : f32
    %74 = vector.broadcast %cst_34 : f32 to vector<8x128xf32>
    %75 = arith.maximumf %73, %74 : vector<8x128xf32>
    %c3 = arith.constant 3 : index
    %c0_35 = arith.constant 0 : index
    %c0_36 = arith.constant 0 : index
    %76 = vector.load %arg2[%c3, %c0_35, %c0_36] : memref<6x128x128xbf16, #tpu.memory_space<vmem>>, vector<1x128x128xbf16>
    %77 = vector.shape_cast %76 : vector<1x128x128xbf16> to vector<128x128xbf16>
    %c3_37 = arith.constant 3 : index
    %c0_38 = arith.constant 0 : index
    %c0_39 = arith.constant 0 : index
    %78 = vector.load %arg3[%c3_37, %c0_38, %c0_39] : memref<6x1x128xf32, #tpu.memory_space<vmem>>, vector<1x1x128xf32>
    %79 = vector.shape_cast %78 : vector<1x1x128xf32> to vector<1x128xf32>
    %80 = arith.truncf %75 : vector<8x128xf32> to vector<8x128xbf16>
    %cst_40 = arith.constant dense<0.000000e+00> : vector<8x128xf32>
    %81 = tpu.matmul %80, %77, %cst_40 {dimension_numbers = #tpu.dot_dimension_numbers<[1], [0], [0], [1], [0, 0, 1, 1], [], []>} : vector<8x128xbf16>, vector<128x128xbf16>, vector<8x128xf32> -> vector<8x128xf32>
    %cst_41 = arith.constant dense<0.000000e+00> : vector<8x128xf32>
    %82 = tpu.matmul %40, %81, %cst_41 {dimension_numbers = #tpu.dot_dimension_numbers<[1], [0], [0], [1], [0, 0, 1, 1], [], []>} : vector<8x8xf32>, vector<8x128xf32>, vector<8x128xf32> -> vector<8x128xf32>
    %83 = vector.broadcast %79 : vector<1x128xf32> to vector<8x128xf32>
    %84 = arith.addf %82, %83 : vector<8x128xf32>
    %cst_42 = arith.constant 0.000000e+00 : f32
    %85 = vector.broadcast %cst_42 : f32 to vector<8x128xf32>
    %86 = arith.maximumf %84, %85 : vector<8x128xf32>
    %c4 = arith.constant 4 : index
    %c0_43 = arith.constant 0 : index
    %c0_44 = arith.constant 0 : index
    %87 = vector.load %arg2[%c4, %c0_43, %c0_44] : memref<6x128x128xbf16, #tpu.memory_space<vmem>>, vector<1x128x128xbf16>
    %88 = vector.shape_cast %87 : vector<1x128x128xbf16> to vector<128x128xbf16>
    %c4_45 = arith.constant 4 : index
    %c0_46 = arith.constant 0 : index
    %c0_47 = arith.constant 0 : index
    %89 = vector.load %arg3[%c4_45, %c0_46, %c0_47] : memref<6x1x128xf32, #tpu.memory_space<vmem>>, vector<1x1x128xf32>
    %90 = vector.shape_cast %89 : vector<1x1x128xf32> to vector<1x128xf32>
    %91 = arith.truncf %86 : vector<8x128xf32> to vector<8x128xbf16>
    %cst_48 = arith.constant dense<0.000000e+00> : vector<8x128xf32>
    %92 = tpu.matmul %91, %88, %cst_48 {dimension_numbers = #tpu.dot_dimension_numbers<[1], [0], [0], [1], [0, 0, 1, 1], [], []>} : vector<8x128xbf16>, vector<128x128xbf16>, vector<8x128xf32> -> vector<8x128xf32>
    %93 = vector.broadcast %90 : vector<1x128xf32> to vector<8x128xf32>
    %94 = arith.addf %92, %93 : vector<8x128xf32>
    %cst_49 = arith.constant 0.000000e+00 : f32
    %95 = vector.broadcast %cst_49 : f32 to vector<8x128xf32>
    %96 = arith.maximumf %94, %95 : vector<8x128xf32>
    %c5 = arith.constant 5 : index
    %c0_50 = arith.constant 0 : index
    %c0_51 = arith.constant 0 : index
    %97 = vector.load %arg2[%c5, %c0_50, %c0_51] : memref<6x128x128xbf16, #tpu.memory_space<vmem>>, vector<1x128x128xbf16>
    %98 = vector.shape_cast %97 : vector<1x128x128xbf16> to vector<128x128xbf16>
    %c5_52 = arith.constant 5 : index
    %c0_53 = arith.constant 0 : index
    %c0_54 = arith.constant 0 : index
    %99 = vector.load %arg3[%c5_52, %c0_53, %c0_54] : memref<6x1x128xf32, #tpu.memory_space<vmem>>, vector<1x1x128xf32>
    %100 = vector.shape_cast %99 : vector<1x1x128xf32> to vector<1x128xf32>
    %101 = arith.truncf %96 : vector<8x128xf32> to vector<8x128xbf16>
    %cst_55 = arith.constant dense<0.000000e+00> : vector<8x128xf32>
    %102 = tpu.matmul %101, %98, %cst_55 {dimension_numbers = #tpu.dot_dimension_numbers<[1], [0], [0], [1], [0, 0, 1, 1], [], []>} : vector<8x128xbf16>, vector<128x128xbf16>, vector<8x128xf32> -> vector<8x128xf32>
    %103 = vector.broadcast %100 : vector<1x128xf32> to vector<8x128xf32>
    %104 = arith.addf %102, %103 : vector<8x128xf32>
    %cst_56 = arith.constant 0.000000e+00 : f32
    %105 = vector.broadcast %cst_56 : f32 to vector<8x128xf32>
    %106 = arith.maximumf %104, %105 : vector<8x128xf32>
    %c0_57 = arith.constant 0 : index
    %c0_58 = arith.constant 0 : index
    %107 = vector.load %arg4[%c0_57, %c0_58] : memref<8x128xf32, #tpu.memory_space<vmem>>, vector<8x128xf32>
    tpu.vector_store %arg4[%c0_57, %c0_58], %106 {strides = array<i32>} : memref<8x128xf32, #tpu.memory_space<vmem>>, vector<8x128xf32>,
    return
  }
}

</mosaic_0001>

<bundles_post_ra>
// kernel: forward.1
= control target key start
LH: loop header
LB: loop body
LE: loop exit
PB: predicated region body
PF: predicated region fallthrough
CT: control target
= control target key end

     0   :  { %9 = vsyncpa [#allocation3], 0  ;;  %s1125_s0 = inlined_call_operand.vmem [shape: s32[2,128], index: 0, kind: input, shape index: {}]   ;;  %s1126_s1 = inlined_call_operand.vmem [shape: f32[8,128], index: 1, kind: input, shape index: {}]   ;;  %s1127_s2 = inlined_call_operand.hbm [shape: bf16[6,128,128], index: 2, kind: input, shape index: {}]   ;;  %s1128_s3 = inlined_call_operand.vmem [shape: f32[6,1,128], index: 3, kind: input, shape index: {}]   ;;  %s1129_s4 = inlined_call_operand.hbm [shape: f32[8,128], index: 4, kind: output, shape index: {}]  }
   0x1   :  { %10 = vsyncpa [#allocation4], 0  ;;  %s19_s17 = sshll.u32 %s1127_s2, 4  ;;  %s1054_s18 = smov [#allocation2]   ;;  %s20_s17 = int_to_ptr.hbm [resolvable:$true] %s19_s17 }
   0x2   :  { %s21_s19 = sshll.u32 %s1054_s18, 4  ;;  %s1055_s20 = smov 64   ;;  %s22_s19 = int_to_ptr.vmem [resolvable:$true] %s21_s19 }
   0x3   :  { %s1056_s21 = smov 4  }
   0x4   :  { %27 = dma.hbm_to_vmem [thread:$0]  %s20_s17, 6144, %s22_s19, [#allocation3], %s1055_s20, %s1055_s20, %s1056_s21  }
   0x5   :  { %1050 = dma.done.wait [#allocation3], 6144  }
   0x6   :  { %1051 = vsyncadd [#allocation3], 4294961152  ;;  %v35_v0 = vlaneseq  ;;  %v34_v2 = vld [vmem:[%s1125_s0] sm:$0x3]  ;;  %v1057_v5 = vmov 1.0   ;;  %v1058_v7 = vmov 0.0  }
   0x7   :  { %v37_v3 = vperm.slane %v34_v2, 0  ;;  %v41_v4 = vperm.slane %v34_v2, 1  ;;  %vm71_vm3 = vcmask 64512   ;;  %v943_v27 = vld [vmem:[#allocation2 + $0x38] sm:$0xff]  ;;  %v942_v29 = vld [vmem:[#allocation2 + $0x30] sm:$0xff]  ;;  %v941_v30 = vld [vmem:[#allocation2 + $0x28] sm:$0xff] }
   0x8   :  { %v36_v1 = vshrl.u32 %v35_v0, 7  ;;  %v66_v6 = vand.u32 127, %v35_v0  ;;  %v940_v31 = vld [vmem:[#allocation2 + $0x20] sm:$0xff]  ;;  %v939_v32 = vld [vmem:[#allocation2 + $0x18] sm:$0xff]  ;;  %v938_v33 = vld [vmem:[#allocation2 + $0x10] sm:$0xff]  ;;  %s1059_s9 = smov [#allocation5]  }
   0x9   :  { %v937_v34 = vld [vmem:[#allocation2 + $0x8] sm:$0xff]  ;;  %v936_v35 = vld [vmem:[#allocation2] sm:$0xff]  ;;  %v951_v38 = vld [vmem:[#allocation2 + $0x78] sm:$0xff]  ;;  %s717_s10 = sshll.u32 %s1059_s9, 4  ;;  %s719_s13 = sshll.u32 %s1129_s4, 4  ;;  %s718_s10 = int_to_ptr.vmem [resolvable:$true] %s717_s10  ;;  %s720_s13 = int_to_ptr.hbm [resolvable:$true] %s719_s13 }
   0xa   :  { %vm38_vm0 = vcmp.eq.s32.totalorder %v36_v1, %v37_v3  ;;  %vm42_vm1 = vcmp.eq.s32.totalorder %v36_v1, %v41_v4  ;;  %vm67_vm2 = vcmp.eq.s32.totalorder %v36_v1, %v66_v6  ;;  %v141_v36 = vld [vmem:[%s1126_s1] sm:$0xff]  ;;  %314 = vmatpush.bf16.msra.mxu1 %v951_v38  ;;  %v950_v39 = vld [vmem:[#allocation2 + $0x70] sm:$0xff]  ;;  %v949_v40 = vld [vmem:[#allocation2 + $0x68] sm:$0xff] }
   0xb   :  { %731 = vmatpush.xpose.msk.msra.mxu0 %vm38_vm0, %v1057_v5  ;;  %v733_v8 = vsel %vm67_vm2, 1.0, %v1058_v7  ;;  %v159_v37 = vpack.c.bf16 %v141_v36, %v141_v36  ;;  %v948_v41 = vld [vmem:[#allocation2 + $0x60] sm:$0xff]  ;;  %v947_v42 = vld [vmem:[#allocation2 + $0x58] sm:$0xff]  ;;  %v946_v43 = vld [vmem:[#allocation2 + $0x50] sm:$0xff] }
   0xc   :  { %v945_v44 = vld [vmem:[#allocation2 + $0x48] sm:$0xff]  ;;  %v944_v46 = vld [vmem:[#allocation2 + $0x40] sm:$0xff]  ;;  %v959_v50 = vld [vmem:[#allocation2 + $0xb8] sm:$0xff] }
   0xd   :  { %v990_v47 = vld [vmem:[%s1128_s3] ss:$0 sm:$0xff]  ;;  %396 = vmatpush.bf16.msra.mxu2 %v959_v50  ;;  %v958_v52 = vld [vmem:[#allocation2 + $0xb0] sm:$0xff]  ;;  %v957_v53 = vld [vmem:[#allocation2 + $0xa8] sm:$0xff] }
   0xe   :  { %732 = vmatmul.msk.f32.vlgmr.msra.gmra.mxu0 %vm42_vm1, %v1057_v5  ;;  %315 = vmatpush.bf16.msra.mxu1 %v950_v39  ;;  %v956_v56 = vld [vmem:[#allocation2 + $0xa0] sm:$0xff]  ;;  %v955_v58 = vld [vmem:[#allocation2 + $0x98] sm:$0xff]  ;;  %v954_v59 = vld [vmem:[#allocation2 + $0x90] sm:$0xff] }
   0xf   :  { %v953_v7 = vld [vmem:[#allocation2 + $0x88] sm:$0xff]  ;;  %v968_v39 = vld [vmem:[#allocation2 + $0x100] sm:$0xff] }
  0x10   :  { %v969_v38 = vld [vmem:[#allocation2 + $0x108] sm:$0xff] }
  0x11   :  { %397 = vmatpush.bf16.msra.mxu2 %v958_v52  ;;  %v976_v52 = vld [vmem:[#allocation2 + $0x140] sm:$0xff] }
  0x12   :  { %316 = vmatpush.bf16.msra.mxu1 %v949_v40  ;;  %v983_v40 = vld [vmem:[#allocation2 + $0x178] sm:$0xff] }
  0x15   :  { %398 = vmatpush.bf16.msra.mxu2 %v957_v53  ;;  %v994_v53 = vld [vmem:[%s1128_s3 + $0x4] ss:$0 sm:$0xff] }
  0x16   :  { %317 = vmatpush.bf16.msra.mxu1 %v948_v41  ;;  %v982_v41 = vld [vmem:[#allocation2 + $0x170] sm:$0xff] }
  0x19   :  { %399 = vmatpush.bf16.msra.mxu2 %v956_v56 }
  0x1a   :  { %318 = vmatpush.bf16.msra.mxu1 %v947_v42  ;;  %v981_v42 = vld [vmem:[#allocation2 + $0x168] sm:$0xff] }
  0x1d   :  { %400 = vmatpush.bf16.msra.mxu2 %v955_v58 }
  0x1e   :  { %319 = vmatpush.bf16.msra.mxu1 %v946_v43  ;;  %v980_v43 = vld [vmem:[#allocation2 + $0x160] sm:$0xff] }
  0x21   :  { %401 = vmatpush.bf16.msra.mxu2 %v954_v59  ;;  %v995_v59 = vld [vmem:[%s1128_s3 + $0x5] ss:$0 sm:$0xff] }
  0x22   :  { %320 = vmatpush.bf16.msra.mxu1 %v945_v44  ;;  %v979_v44 = vld [vmem:[#allocation2 + $0x158] sm:$0xff] }
  0x25   :  { %402 = vmatpush.bf16.msra.mxu2 %v953_v7 }
  0x26   :  { %321 = vmatpush.bf16.msra.mxu1 %v944_v46  ;;  %v978_v46 = vld [vmem:[#allocation2 + $0x150] sm:$0xff] }
  0x8b   :  { %v62_v9 = vpop.f32.mrf.mxu0 }
  0x8c   :  { %v70_v10 = vmul.f32 %v733_v8, %v62_v9 }
  0x8e   :  { %v72_v11 = vsel %vm71_vm3, %v70_v10, 0.0 }
  0x8f   :  { %73 = vadd.xlane.f32.xlu0 %v72_v11 }
 0x102   :  { %v74_v12 = vpop.xlane.xlu0 %73 }
 0x103   :  { %vm75_vm4 = vcmp.gt.f32.partialorder %v74_v12, 0.0 }
 0x104   :  { %v76_v13 = vsel %vm75_vm4, 0.0, %v1057_v5 }
 0x105   :  { %v77_v14 = vmul.f32 %v733_v8, %v76_v13 }
 0x107   :  { %v78_v15 = vadd.f32 %v77_v14, %v62_v9  ;;  %v991_v9 = vld [vmem:[%s1128_s3 + $0x1] ss:$0 sm:$0xff] }
 0x109   :  { %v79_v16 = vsel %vm71_vm3, %v78_v15, 0.0 }
 0x10a   :  { %80 = vadd.xlane.f32.xlu0 %v79_v16 }
 0x17d   :  { %v81_v17 = vpop.xlane.xlu0 %80 }
 0x17e   :  { %996 = vrsqrt.f32 %v81_v17  ;;  %vm89_vm6 = vweird.f32 %v81_v17  ;;  %vm82_vm8 = vcmp.gt.f32.partialorder %v81_v17, 0.0 }
 0x184   :  { %v997_v18 = vpop.eup %996 }
 0x185   :  { %v84_v19 = vmul.f32 %v997_v18, %v81_v17  ;;  %vm90_vm5 = vweird.f32 %v997_v18  ;;  %v966_v17 = vld [vmem:[#allocation2 + $0xf0] sm:$0xff] }
 0x186   :  { %vm91_vm7 = vmor %vm89_vm6, %vm90_vm5 }
 0x187   :  { %v85_v20 = vmul.f32 %v997_v18, %v84_v19 }
 0x189   :  { %v86_v21 = vmul.f32 0.5, %v85_v20  ;;  %v964_v20 = vld [vmem:[#allocation2 + $0xe0] sm:$0xff] }
 0x18b   :  { %v87_v22 = vsub.f32 1.5, %v86_v21  ;;  %v963_v21 = vld [vmem:[#allocation2 + $0xd8] sm:$0xff] }
 0x18d   :  { %v88_v23 = vmul.f32 %v997_v18, %v87_v22  ;;  %v962_v22 = vld [vmem:[#allocation2 + $0xd0] sm:$0xff] }
 0x18f   :  { %v92_v24 = vsel %vm91_vm7, %v997_v18, %v88_v23  ;;  %v965_v18 = vld [vmem:[#allocation2 + $0xe8] sm:$0xff] }
 0x190   :  { %v93_v25 = vsel %vm82_vm8, %v92_v24, 0.0  ;;  %v961_v23 = vld [vmem:[#allocation2 + $0xc8] sm:$0xff]  ;;  %v960_v24 = vld [vmem:[#allocation2 + $0xc0] sm:$0xff] }
 0x191   :  { %v94_v26 = vmul.f32 %v733_v8, %v93_v25  ;;  %v952_v8 = vld [vmem:[#allocation2 + $0x80] sm:$0xff] }
 0x192   :  { %403 = vmatpush.bf16.msra.mxu2 %v952_v8  ;;  %v992_v25 = vld [vmem:[%s1128_s3 + $0x2] ss:$0 sm:$0xff] }
 0x193   :  { %113 = vmatpush.msra.mxu3 %v94_v26 }
 0x194   :  { %734 = vmatmul.msk.f32.vlgmr.msra.gmra.mxu3 %vm71_vm3, %v78_v15  ;;  %v967_v15 = vld [vmem:[#allocation2 + $0xf8] sm:$0xff] }
 0x196   :  { %697 = vmatpush.bf16.msrb.mxu2 %v983_v40 }
 0x19a   :  { %698 = vmatpush.bf16.msrb.mxu2 %v982_v41 }
 0x19e   :  { %699 = vmatpush.bf16.msrb.mxu2 %v981_v42 }
 0x1a2   :  { %700 = vmatpush.bf16.msrb.mxu2 %v980_v43 }
 0x1a6   :  { %701 = vmatpush.bf16.msrb.mxu2 %v979_v44 }
 0x1aa   :  { %702 = vmatpush.bf16.msrb.mxu2 %v978_v46 }
 0x217   :  { %v115_v28 = vpop.f32.mrf.mxu3 }
 0x218   :  { %136 = vmatpush.msrb.mxu3 %v115_v28 }
 0x219   :  { %735 = vmatmul.msk.f32.vlgmr.msrb.gmra.mxu3 %vm71_vm3, %v94_v26 }
 0x21a   :  { %211 = vmatpush.bf16.msra.mxu3 %v943_v27 }
 0x21e   :  { %212 = vmatpush.bf16.msra.mxu3 %v942_v29 }
 0x222   :  { %213 = vmatpush.bf16.msra.mxu3 %v941_v30  ;;  %v975_v30 = vld [vmem:[#allocation2 + $0x138] sm:$0xff] }
 0x223   :  { %612 = vmatpush.bf16.msrb.mxu1 %v975_v30 }
 0x226   :  { %214 = vmatpush.bf16.msra.mxu3 %v940_v31  ;;  %v974_v31 = vld [vmem:[#allocation2 + $0x130] sm:$0xff] }
 0x227   :  { %613 = vmatpush.bf16.msrb.mxu1 %v974_v31 }
 0x22a   :  { %215 = vmatpush.bf16.msra.mxu3 %v939_v32  ;;  %v973_v32 = vld [vmem:[#allocation2 + $0x128] sm:$0xff] }
 0x22b   :  { %614 = vmatpush.bf16.msrb.mxu1 %v973_v32 }
 0x22e   :  { %216 = vmatpush.bf16.msra.mxu3 %v938_v33  ;;  %v972_v33 = vld [vmem:[#allocation2 + $0x120] sm:$0xff] }
 0x22f   :  { %615 = vmatpush.bf16.msrb.mxu1 %v972_v33 }
 0x232   :  { %217 = vmatpush.bf16.msra.mxu3 %v937_v34  ;;  %v971_v34 = vld [vmem:[#allocation2 + $0x118] sm:$0xff] }
 0x233   :  { %616 = vmatpush.bf16.msrb.mxu1 %v971_v34 }
 0x236   :  { %218 = vmatpush.bf16.msra.mxu3 %v936_v35  ;;  %v970_v35 = vld [vmem:[#allocation2 + $0x110] sm:$0xff] }
 0x237   :  { %617 = vmatpush.bf16.msrb.mxu1 %v970_v35 }
 0x239   :  { %219 = vmatmul.bf16.vlgmr.msra.gmra.mxu3 %v159_v37 }
 0x23b   :  { %618 = vmatpush.bf16.msrb.mxu1 %v969_v38 }
 0x23f   :  { %619 = vmatpush.bf16.msrb.mxu1 %v968_v39 }
 0x29c   :  { %v1098_v45 = vpop.f32.mrf.mxu3 }
 0x2bc   :  { %v220_v48 = vpop.f32.mrf.mxu3 }
 0x2bd   :  { %v221_v49 = vadd.f32 %v990_v47, %v220_v48 }
 0x2bf   :  { %v768_v51 = vmul.f32 -1.442695, %v221_v49 }
 0x2c1   :  { %998 = vpow2.f32 %v768_v51  ;;  %v977_v51 = vld [vmem:[#allocation2 + $0x148] sm:$0xff] }
 0x2c2   :  { %703 = vmatpush.bf16.msrb.mxu2 %v977_v51 }
 0x2c4   :  { %v222_v54 = vpop.f32.mrf.mxu3 }
 0x2c6   :  { %704 = vmatpush.bf16.msrb.mxu2 %v976_v52 }
 0x2c7   :  { %v999_v55 = vpop.eup %998 }
 0x2c8   :  { %v227_v57 = vadd.f32 1.0, %v999_v55 }
 0x2ca   :  { %1000 = vrcp.f32 %v227_v57  ;;  %v239_v63 = vand.u32 2147483648, %v227_v57  ;;  %v237_v1 = vand.u32 2147483647, %v227_v57  ;;  %vm233_vm10 = vweird.f32 %v227_v57 }
 0x2cc   :  { %v240_v3 = vor.u32 1.1754944e-38, %v239_v63  ;;  %vm238_vm12 = vcmp.eq.f32.partialorder %v237_v1, 8.507059e+37 }
 0x2d0   :  { %v1001_v60 = vpop.eup %1000 }
 0x2d1   :  { %v229_v61 = vmul.f32 %v1001_v60, %v227_v57  ;;  %vm234_vm9 = vweird.f32 %v1001_v60 }
 0x2d2   :  { %vm235_vm11 = vmor %vm233_vm10, %vm234_vm9 }
 0x2d3   :  { %v230_v62 = vsub.f32 1.0, %v229_v61 }
 0x2d5   :  { %v231_v0 = vmul.f32 %v1001_v60, %v230_v62 }
 0x2d7   :  { %v232_v2 = vadd.f32 %v1001_v60, %v231_v0 }
 0x2d9   :  { %v236_v4 = vsel %vm235_vm11, %v1001_v60, %v232_v2 }
 0x2da   :  { %v241_v5 = vsel %vm238_vm12, %v240_v3, %v236_v4 }
 0x2db   :  { %v262_v6 = vpack.c.bf16 %v241_v5, %v241_v5 }
 0x2dd   :  { %322 = vmatmul.bf16.vlgmr.msra.gmra.mxu1 %v262_v6 }
 0x35a   :  { %v323_v10 = vpop.f32.mrf.mxu1 }
 0x35b   :  { %v324_v11 = vadd.f32 %v991_v9, %v323_v10 }
 0x35d   :  { %v327_v12 = vmax.f32 %v324_v11, 0.0 }
 0x35f   :  { %v347_v13 = vpack.c.bf16 %v327_v12, %v327_v12 }
 0x361   :  { %404 = vmatmul.bf16.vlgmr.msra.gmra.mxu2 %v347_v13 }
 0x362   :  { %v325_v14 = vpop.f32.mrf.mxu1 }
 0x3e4   :  { %v405_v16 = vpop.f32.mrf.mxu2 }
 0x3e5   :  { %430 = vmatpush.msrb.mxu0 %v405_v16 }
 0x3e6   :  { %835 = vmatmul.msk.f32.vlgmr.msrb.gmra.mxu0 %vm71_vm3, %v1098_v45 }
 0x3e7   :  { %504 = vmatpush.bf16.msra.mxu0 %v967_v15 }
 0x3eb   :  { %505 = vmatpush.bf16.msra.mxu0 %v966_v17 }
 0x3ec   :  { %v407_v19 = vpop.f32.mrf.mxu2 }
 0x3ef   :  { %506 = vmatpush.bf16.msra.mxu0 %v965_v18 }
 0x3f3   :  { %507 = vmatpush.bf16.msra.mxu0 %v964_v20 }
 0x3f7   :  { %508 = vmatpush.bf16.msra.mxu0 %v963_v21 }
 0x3fb   :  { %509 = vmatpush.bf16.msra.mxu0 %v962_v22 }
 0x3ff   :  { %510 = vmatpush.bf16.msra.mxu0 %v961_v23 }
 0x403   :  { %511 = vmatpush.bf16.msra.mxu0 %v960_v24 }
 0x463   :  { %v432_v26 = vpop.f32.mrf.mxu0 }
 0x464   :  { %v433_v27 = vadd.f32 %v992_v25, %v432_v26 }
 0x466   :  { %v435_v28 = vmax.f32 %v433_v27, 0.0 }
 0x468   :  { %v455_v29 = vpack.c.bf16 %v435_v28, %v435_v28 }
 0x46a   :  { %512 = vmatmul.bf16.vlgmr.msra.gmra.mxu0 %v455_v29 }
 0x4e7   :  { %v513_v36 = vpop.f32.mrf.mxu0 }
 0x4e8   :  { %535 = vmatpush.msrb.mxu3 %v513_v36 }
 0x4e9   :  { %869 = vmatmul.msk.f32.vlgmr.msrb.gmra.mxu3 %vm71_vm3, %v1098_v45  ;;  %v993_v45 = vld [vmem:[%s1128_s3 + $0x3] ss:$0 sm:$0xff] }
 0x4ef   :  { %v515_v37 = vpop.f32.mrf.mxu0 }
 0x56c   :  { %v537_v47 = vpop.f32.mrf.mxu3 }
 0x56d   :  { %v538_v48 = vadd.f32 %v993_v45, %v537_v47 }
 0x56f   :  { %v540_v49 = vmax.f32 %v538_v48, 0.0 }
 0x571   :  { %v560_v50 = vpack.c.bf16 %v540_v49, %v540_v49 }
 0x573   :  { %620 = vmatmul.bf16.vlgmr.msrb.gmra.mxu1 %v560_v50 }
 0x5f0   :  { %v621_v54 = vpop.f32.mrf.mxu1 }
 0x5f1   :  { %v622_v55 = vadd.f32 %v994_v53, %v621_v54 }
 0x5f3   :  { %v625_v56 = vmax.f32 %v622_v55, 0.0 }
 0x5f5   :  { %v645_v57 = vpack.c.bf16 %v625_v56, %v625_v56 }
 0x5f7   :  { %705 = vmatmul.bf16.vlgmr.msrb.gmra.mxu2 %v645_v57 }
 0x5f8   :  { %v623_v58 = vpop.f32.mrf.mxu1 }
 0x67a   :  { %v706_v60 = vpop.f32.mrf.mxu2 }
 0x67b   :  { %v707_v61 = vadd.f32 %v995_v59, %v706_v60 }
 0x67d   :  { %v710_v62 = vmax.f32 %v707_v61, 0.0 }
 0x67f   :  { %711 = vst [vmem:[#allocation5] sm:$0xff] %v710_v62 }
 0x680   :  { %722 = dma.vmem_to_hbm [thread:$0]  %s718_s10, 128, %s720_s13, [#allocation4]  }
 0x682   :  { %v708_v63 = vpop.f32.mrf.mxu2 }
 0x683   :  { %1052 = dma.done.wait [#allocation4], 128  }
 0x684   :  { %1053 = vsyncadd [#allocation4], 4294967168 }
 0x685   :  { %727 = vsyncpa [#allocation3], 1 }
 0x686   :  { %728 = vsyncpa [#allocation4], 1 }

</bundles_post_ra>
